<compile_context>
chip_gen: v7x
topology: tpu7x:2x2x1
jax: 0.10.0
libtpu: 0.0.40
codegen_flags: <defaults>
</compile_context>

<pallas_src>
import jax
import jax.numpy as jnp
from jax import lax
from jax.experimental import pallas as pl
from jax.experimental.pallas import tpu as pltpu

SI = 1024      # truncated feature size (first 1024 elements of each flattened sample)
HID = 64       # logical hidden width of the torch module
HIDP = 128     # hidden width padded to a full lane (lane-dense vregs / MXU columns)
EPS = 1e-5     # nn.BatchNorm1d default eps

# Rows of the packed (8, HIDP) parameter buffer.
_B1, _G1, _BE1, _B2, _G2, _BE2, _WO, _BO = range(8)


# ----------------------------------------------------------------------------- params
def init_params(key):
    """Deterministic parameter init mimicking nn.Linear / nn.BatchNorm1d shapes."""
    ks = jax.random.split(key, 8)

    def linear(kw, kb, fan_in, fan_out):
        bound = 1.0 / jnp.sqrt(jnp.float32(fan_in))
        w = jax.random.uniform(kw, (fan_in, fan_out), jnp.float32, -bound, bound)
        b = jax.random.uniform(kb, (1, fan_out), jnp.float32, -bound, bound)
        return w, b

    w1, b1 = linear(ks[0], ks[1], SI, HID)
    w2, b2 = linear(ks[2], ks[3], HID, HID)
    wo, bo = linear(ks[4], ks[5], HID, 1)

    # BatchNorm affine params (gamma ~ 1, beta ~ 0, perturbed so they matter)
    g1 = 1.0 + 0.05 * jax.random.normal(ks[6], (1, HID), jnp.float32)
    be1 = 0.05 * jax.random.normal(ks[7], (1, HID), jnp.float32)
    g2 = jnp.ones((1, HID), jnp.float32) * 1.1
    be2 = jnp.full((1, HID), 0.02, jnp.float32)

    return (w1, b1, g1, be1, w2, b2, g2, be2, wo, bo)


def pack_params(params):
    """One-time weight preprocessing: pad HID 64->128, cast matmul weights to bf16,
    and pack the eight small vectors into a single (8, 128) f32 buffer."""
    w1, b1, g1, be1, w2, b2, g2, be2, wo, bo = params
    w1p = jnp.zeros((SI, HIDP), jnp.float32).at[:, :HID].set(w1).astype(jnp.bfloat16)
    w2p = jnp.zeros((HIDP, HIDP), jnp.float32).at[:HID, :HID].set(w2).astype(jnp.bfloat16)
    pv = jnp.zeros((8, HIDP), jnp.float32)
    pv = pv.at[_B1, :HID].set(b1[0])
    pv = pv.at[_G1, :HID].set(g1[0])
    pv = pv.at[_BE1, :HID].set(be1[0])
    pv = pv.at[_B2, :HID].set(b2[0])
    pv = pv.at[_G2, :HID].set(g2[0])
    pv = pv.at[_BE2, :HID].set(be2[0])
    pv = pv.at[_WO, :HID].set(wo[:, 0])
    pv = pv.at[_BO, 0].set(bo[0, 0])
    return w1p, w2p, pv


def _choose_tb(batch, tb=None):
    if tb is not None:
        assert batch % tb == 0 and (tb % 8 == 0 or tb == batch)
        return tb
    if batch <= 512:
        return batch
    for cand in range(512, 0, -8):           # largest multiple-of-8 divisor <= 512
        if batch % cand == 0:
            return cand
    # TODO(synk): ragged batch tails would need masked BN statistics; fall back to
    # a single full-batch tile instead.
    return batch


# ----------------------------------------------------------------------------- forward
def binary_classification_forward(x, packed_params, tb=None):
    """x: (B, C, L) with C*L > 1024. Returns (B, 1, 1) logits."""
    w1p, w2p, pv = packed_params
    B, C, L = x.shape
    CL = C * L
    assert CL > SI, "module requires x.size(1) * x.size(2) > 1024"

    tb = _choose_tb(B, tb)
    n_tiles = B // tb
    last_tile = n_tiles - 1
    inv_b = 1.0 / float(B)

    # torch's per-sample flatten()[:1024] == row-major reshape; the x BlockSpec
    # below reads only the first SI columns, so no truncated copy is materialized.
    x_flat = x.reshape(B, CL)

    def kernel(x_ref, w1_ref, w2_ref, pv_ref, o_ref, h_ref, st_ref):
        p = pl.program_id(0)     # phase: 0 = layer_1, 1 = layer_2 stats, 2 = output
        i = pl.program_id(1)     # batch tile

        # ---- phase 0: h1 = relu(x @ W1 + b1); cache h1; accumulate BN1 stats ---
        @pl.when(p == 0)
        def _():
            @pl.when(i == 0)
            def _():
                st_ref[...] = jnp.zeros((4, HIDP), jnp.float32)
            xb = x_ref[...].astype(jnp.bfloat16)          # bf16 MXU, f32 accumulate
            h1 = jnp.dot(xb, w1_ref[...], preferred_element_type=jnp.float32)
            h1 = jnp.maximum(h1 + pv_ref[_B1:_B1 + 1, :], 0.0)
            h_ref[i] = h1
            st_ref[0:1, :] += jnp.sum(h1, axis=0, keepdims=True)
            st_ref[1:2, :] += jnp.sum(h1 * h1, axis=0, keepdims=True)

        # ---- phase 1: fold BN1 -> cache h1n in place; h2 stats (h2 not cached) -
        @pl.when(p == 1)
        def _():
            mu1 = st_ref[0:1, :] * inv_b
            var1 = st_ref[1:2, :] * inv_b - mu1 * mu1          # biased variance
            scale1 = pv_ref[_G1:_G1 + 1, :] * lax.rsqrt(var1 + EPS)
            shift1 = pv_ref[_BE1:_BE1 + 1, :] - mu1 * scale1
            h1n = h_ref[i] * scale1 + shift1                   # folded BN: mul + add
            h_ref[i] = h1n                                     # overwrite cache in place
            h2 = jnp.dot(h1n.astype(jnp.bfloat16), w2_ref[...],
                         preferred_element_type=jnp.float32)
            h2 = jnp.maximum(h2 + pv_ref[_B2:_B2 + 1, :], 0.0)
            st_ref[2:3, :] += jnp.sum(h2, axis=0, keepdims=True)
            st_ref[3:4, :] += jnp.sum(h2 * h2, axis=0, keepdims=True)

        # ---- phase 2: recompute h2 (bit-identical) -> BN2 -> dropout -> layer_out
        @pl.when(p == 2)
        def _():
            mu2 = st_ref[2:3, :] * inv_b
            var2 = st_ref[3:4, :] * inv_b - mu2 * mu2
            scale2 = pv_ref[_G2:_G2 + 1, :] * lax.rsqrt(var2 + EPS)
            shift2 = pv_ref[_BE2:_BE2 + 1, :] - mu2 * scale2
            # Recompute h2 from the cached h1n: same bf16 inputs, same matmul ->
            # exactly the values the BN2 statistics were accumulated from.
            h2 = jnp.dot(h_ref[i].astype(jnp.bfloat16), w2_ref[...],
                         preferred_element_type=jnp.float32)
            h2 = jnp.maximum(h2 + pv_ref[_B2:_B2 + 1, :], 0.0)
            h2n = h2 * scale2 + shift2
            # TODO(synk): nn.Dropout(p=0.1) stochastic mask not reproduced (identity).
            # N=1 matmul replaced by a VPU broadcast-multiply + lane reduction:
            logits = jnp.sum(h2n * pv_ref[_WO:_WO + 1, :], axis=-1, keepdims=True)
            o_ref[...] = logits + pv_ref[_BO:_BO + 1, 0:1]

    # x is only consumed in phase 0; later phases park on the LAST block consumed,
    # so no x tile is ever re-streamed from HBM after phase 0.
    x_spec = pl.BlockSpec((tb, SI), lambda p, i: (jnp.where(p == 0, i, last_tile), 0))
    w1_spec = pl.BlockSpec((SI, HIDP), lambda p, i: (0, 0))      # VMEM-resident
    w2_spec = pl.BlockSpec((HIDP, HIDP), lambda p, i: (0, 0))
    pv_spec = pl.BlockSpec((8, HIDP), lambda p, i: (0, 0))
    # Output block 0 stays resident (never flushed) until phase 2 writes it.
    o_spec = pl.BlockSpec((tb, 1), lambda p, i: (jnp.where(p == 2, i, 0), 0))

    cost = pl.CostEstimate(
        flops=2 * B * SI * HIDP + 2 * (2 * B * HIDP * HIDP) + 2 * B * HIDP,
        transcendentals=2 * HIDP * n_tiles,
        bytes_accessed=(B * SI * x_flat.dtype.itemsize
                        + w1p.size * w1p.dtype.itemsize
                        + w2p.size * w2p.dtype.itemsize
                        + pv.size * pv.dtype.itemsize
                        + B * 4),
    )

    # VMEM footprint: persistent h cache + double-buffered inputs/outputs.
    vmem_need = (B * HIDP * 4                 # h cache (f32, whole batch)
                 + 2 * tb * SI * 4            # double-buffered x tiles
                 + 2 * SI * HIDP * 2          # W1 (bf16)
                 + 2 * HIDP * HIDP * 2        # W2 (bf16)
                 + 2 * 8 * HIDP * 4           # packed params
                 + 4 * HIDP * 4               # BN stats scratch
                 + 2 * tb * 4)                # output tiles
    vmem_limit = min(100 * 1024 * 1024, max(32 * 1024 * 1024, int(vmem_need * 5 // 4)))

    out = pl.pallas_call(
        kernel,
        out_shape=jax.ShapeDtypeStruct((B, 1), jnp.float32),
        grid=(3, n_tiles),
        in_specs=[x_spec, w1_spec, w2_spec, pv_spec],
        out_specs=o_spec,
        scratch_shapes=[
            pltpu.VMEM((n_tiles, tb, HIDP), jnp.float32),   # h1 / h1n cache (in place)
            pltpu.VMEM((4, HIDP), jnp.float32),             # BN sum / sum-of-squares
        ],
        compiler_params=pltpu.CompilerParams(
            # Both axes 'arbitrary': exact full-batch BN statistics are accumulated
            # in shared VMEM scratch across tiles; 'parallel' (v7x 2 TCs) would
            # give per-core statistics and change module semantics.
            dimension_semantics=("arbitrary", "arbitrary"),
            vmem_limit_bytes=vmem_limit,
        ),
        cost_estimate=cost,
    )(x_flat, w1p, w2p, pv)

    # torch's unsqueeze_(1) makes layer_out emit (B, 1, 1)
    return out.reshape(B, 1, 1)


# ----------------------------------------------------------------------------- reference
def reference_forward(x, params):
    """Pure-JAX reference mirroring the kernel math (bf16 matmuls, f32 BN)."""
    w1, b1, g1, be1, w2, b2, g2, be2, wo, bo = params
    B = x.shape[0]
    xf = x.reshape(B, -1)[:, :SI].astype(jnp.float32)
    h = jnp.dot(xf.astype(jnp.bfloat16), w1.astype(jnp.bfloat16),
                preferred_element_type=jnp.float32) + b1
    h = jnp.maximum(h, 0.0)
    mu = jnp.mean(h, axis=0, keepdims=True)
    var = jnp.mean(h * h, axis=0, keepdims=True) - mu * mu
    h = (h - mu) * lax.rsqrt(var + EPS) * g1 + be1
    h = jnp.dot(h.astype(jnp.bfloat16), w2.astype(jnp.bfloat16),
                preferred_element_type=jnp.float32) + b2
    h = jnp.maximum(h, 0.0)
    mu = jnp.mean(h, axis=0, keepdims=True)
    var = jnp.mean(h * h, axis=0, keepdims=True) - mu * mu
    h = (h - mu) * lax.rsqrt(var + EPS) * g2 + be2
    out = jnp.dot(h, wo) + bo
    return out.reshape(B, 1, 1)


if __name__ == "__main__":
    key = jax.random.PRNGKey(0)
    k_x, k_p = jax.random.split(key)

    # Small 3-D input; C*L = 40*32 = 1280 > 1024 as the forward requires.
    B, C, L = 16, 40, 32
    x = jax.random.normal(k_x, (B, C, L), jnp.float32)

    params = init_params(k_p)
    packed = pack_params(params)

    # tb=8 -> 2 batch tiles: exercises cross-tile (exact full-batch) BN statistics.
    y = binary_classification_forward(x, packed, tb=8)
    y = jax.block_until_ready(y)

    assert y.shape == (B, 1, 1), y.shape
    assert bool(jnp.all(jnp.isfinite(y)))

    y_ref = reference_forward(x, params)
    err = float(jnp.max(jnp.abs(y - y_ref)))
    assert err < 5e-2, f"max abs err vs reference = {err}"

    print("KERNEL_OK")
</pallas_src>

<mosaic_0001>
module attributes {stable_mosaic.version = 11 : i64} {
  func.func @kernel(%arg0: i32, %arg1: i32, %arg2: memref<8x1024xf32, #tpu.memory_space<vmem>>, %arg3: memref<1024x128xbf16, #tpu.memory_space<vmem>>, %arg4: memref<128x128xbf16, #tpu.memory_space<vmem>>, %arg5: memref<8x128xf32, #tpu.memory_space<vmem>>, %arg6: memref<8x1xf32, #tpu.memory_space<vmem>>, %arg7: memref<2x8x128xf32, #tpu.memory_space<vmem>>, %arg8: memref<4x128xf32, #tpu.memory_space<vmem>>) attributes {dimension_semantics = [#tpu.dimension_semantics<arbitrary>, #tpu.dimension_semantics<arbitrary>], iteration_bounds = array<i64: 3, 2>, scalar_prefetch = 0 : i64, scratch_operands = 2 : i64, tpu.core_type = #tpu.core_type<tc>, window_params = [{transform_indices = @transform_0, window_bounds = array<i64: 8, 1024>}, {pipeline_mode = #tpu.pipeline_mode<synchronous>, transform_indices = @transform_1, window_bounds = array<i64: 1024, 128>}, {pipeline_mode = #tpu.pipeline_mode<synchronous>, transform_indices = @transform_2, window_bounds = array<i64: 128, 128>}, {pipeline_mode = #tpu.pipeline_mode<synchronous>, transform_indices = @transform_3, window_bounds = array<i64: 8, 128>}, {transform_indices = @transform_4, window_bounds = array<i64: 8, 1>}]} {
    %c0_i32 = arith.constant 0 : i32
    %0 = arith.cmpi eq, %arg0, %c0_i32 : i32
    %1 = arith.extui %0 : i1 to i32
    %c0_i32_0 = arith.constant 0 : i32
    %2 = arith.cmpi ne, %1, %c0_i32_0 : i32
    scf.if %2 {
      %c0_i32_3 = arith.constant 0 : i32
      %9 = arith.cmpi eq, %arg1, %c0_i32_3 : i32
      %10 = arith.extui %9 : i1 to i32
      %c0_i32_4 = arith.constant 0 : i32
      %11 = arith.cmpi ne, %10, %c0_i32_4 : i32
      scf.if %11 {
        %cst_22 = arith.constant 0.000000e+00 : f32
        %36 = vector.broadcast %cst_22 : f32 to vector<4x128xf32>
        %c0_23 = arith.constant 0 : index
        %c0_24 = arith.constant 0 : index
        %37 = vector.load %arg8[%c0_23, %c0_24] : memref<4x128xf32, #tpu.memory_space<vmem>>, vector<4x128xf32>
        tpu.vector_store %arg8[%c0_23, %c0_24], %36 {strides = array<i32>} : memref<4x128xf32, #tpu.memory_space<vmem>>, vector<4x128xf32>,
      } else {
      }
      %c0 = arith.constant 0 : index
      %c0_5 = arith.constant 0 : index
      %12 = vector.load %arg2[%c0, %c0_5] : memref<8x1024xf32, #tpu.memory_space<vmem>>, vector<8x1024xf32>
      %13 = arith.truncf %12 : vector<8x1024xf32> to vector<8x1024xbf16>
      %c0_6 = arith.constant 0 : index
      %c0_7 = arith.constant 0 : index
      %14 = vector.load %arg3[%c0_6, %c0_7] : memref<1024x128xbf16, #tpu.memory_space<vmem>>, vector<1024x128xbf16>
      %cst = arith.constant dense<0.000000e+00> : vector<8x128xf32>
      %15 = tpu.matmul %13, %14, %cst {dimension_numbers = #tpu.dot_dimension_numbers<[1], [0], [0], [1], [0, 0, 1, 1], [], []>} : vector<8x1024xbf16>, vector<1024x128xbf16>, vector<8x128xf32> -> vector<8x128xf32>
      %c0_8 = arith.constant 0 : index
      %c0_9 = arith.constant 0 : index
      %16 = vector.load %arg5[%c0_8, %c0_9] : memref<8x128xf32, #tpu.memory_space<vmem>>, vector<1x128xf32>
      %17 = vector.broadcast %16 : vector<1x128xf32> to vector<8x128xf32>
      %18 = arith.addf %15, %17 : vector<8x128xf32>
      %cst_10 = arith.constant 0.000000e+00 : f32
      %19 = vector.broadcast %cst_10 : f32 to vector<8x128xf32>
      %20 = arith.maximumf %18, %19 : vector<8x128xf32>
      %21 = arith.index_cast %arg1 : i32 to index
      %c0_11 = arith.constant 0 : index
      %c0_12 = arith.constant 0 : index
      %22 = vector.load %arg7[%21, %c0_11, %c0_12] : memref<2x8x128xf32, #tpu.memory_space<vmem>>, vector<1x8x128xf32>
      %23 = vector.shape_cast %22 : vector<1x8x128xf32> to vector<8x128xf32>
      %24 = vector.shape_cast %20 : vector<8x128xf32> to vector<1x8x128xf32>
      tpu.vector_store %arg7[%21, %c0_11, %c0_12], %24 {strides = array<i32>} : memref<2x8x128xf32, #tpu.memory_space<vmem>>, vector<1x8x128xf32>,
      %c0_13 = arith.constant 0 : index
      %c0_14 = arith.constant 0 : index
      %25 = vector.load %arg8[%c0_13, %c0_14] : memref<4x128xf32, #tpu.memory_space<vmem>>, vector<1x128xf32>
      %cst_15 = arith.constant dense<0.000000e+00> : vector<128xf32>
      %26 = vector.multi_reduction <add>, %20, %cst_15 [0] : vector<8x128xf32> to vector<128xf32>
      %27 = vector.shape_cast %26 : vector<128xf32> to vector<1x128xf32>
      %28 = arith.addf %25, %27 : vector<1x128xf32>
      %c0_16 = arith.constant 0 : index
      %c0_17 = arith.constant 0 : index
      %29 = vector.load %arg8[%c0_16, %c0_17] : memref<4x128xf32, #tpu.memory_space<vmem>>, vector<1x128xf32>
      tpu.vector_store %arg8[%c0_16, %c0_17], %28 {strides = array<i32>} : memref<4x128xf32, #tpu.memory_space<vmem>>, vector<1x128xf32>,
      %c1 = arith.constant 1 : index
      %c0_18 = arith.constant 0 : index
      %30 = vector.load %arg8[%c1, %c0_18] : memref<4x128xf32, #tpu.memory_space<vmem>>, vector<1x128xf32>
      %31 = arith.mulf %20, %20 : vector<8x128xf32>
      %cst_19 = arith.constant dense<0.000000e+00> : vector<128xf32>
      %32 = vector.multi_reduction <add>, %31, %cst_19 [0] : vector<8x128xf32> to vector<128xf32>
      %33 = vector.shape_cast %32 : vector<128xf32> to vector<1x128xf32>
      %34 = arith.addf %30, %33 : vector<1x128xf32>
      %c1_20 = arith.constant 1 : index
      %c0_21 = arith.constant 0 : index
      %35 = vector.load %arg8[%c1_20, %c0_21] : memref<4x128xf32, #tpu.memory_space<vmem>>, vector<1x128xf32>
      tpu.vector_store %arg8[%c1_20, %c0_21], %34 {strides = array<i32>} : memref<4x128xf32, #tpu.memory_space<vmem>>, vector<1x128xf32>,
    } else {
    }
    %c1_i32 = arith.constant 1 : i32
    %3 = arith.cmpi eq, %arg0, %c1_i32 : i32
    %4 = arith.extui %3 : i1 to i32
    %c0_i32_1 = arith.constant 0 : i32
    %5 = arith.cmpi ne, %4, %c0_i32_1 : i32
    scf.if %5 {
      %c0 = arith.constant 0 : index
      %c0_3 = arith.constant 0 : index
      %9 = vector.load %arg8[%c0, %c0_3] : memref<4x128xf32, #tpu.memory_space<vmem>>, vector<1x128xf32>
      %cst = arith.constant 6.250000e-02 : f32
      %10 = vector.broadcast %cst : f32 to vector<1x128xf32>
      %11 = arith.mulf %9, %10 : vector<1x128xf32>
      %c1 = arith.constant 1 : index
      %c0_4 = arith.constant 0 : index
      %12 = vector.load %arg8[%c1, %c0_4] : memref<4x128xf32, #tpu.memory_space<vmem>>, vector<1x128xf32>
      %cst_5 = arith.constant 6.250000e-02 : f32
      %13 = vector.broadcast %cst_5 : f32 to vector<1x128xf32>
      %14 = arith.mulf %12, %13 : vector<1x128xf32>
      %15 = arith.mulf %11, %11 : vector<1x128xf32>
      %16 = arith.subf %14, %15 : vector<1x128xf32>
      %c1_6 = arith.constant 1 : index
      %c0_7 = arith.constant 0 : index
      %17 = vector.load %arg5[%c1_6, %c0_7] : memref<8x128xf32, #tpu.memory_space<vmem>>, vector<1x128xf32>
      %cst_8 = arith.constant 9.99999974E-6 : f32
      %18 = vector.broadcast %cst_8 : f32 to vector<1x128xf32>
      %19 = arith.addf %16, %18 : vector<1x128xf32>
      %20 = math.rsqrt %19 : vector<1x128xf32>
      %21 = arith.mulf %17, %20 : vector<1x128xf32>
      %c2 = arith.constant 2 : index
      %c0_9 = arith.constant 0 : index
      %22 = vector.load %arg5[%c2, %c0_9] : memref<8x128xf32, #tpu.memory_space<vmem>>, vector<1x128xf32>
      %23 = arith.mulf %11, %21 : vector<1x128xf32>
      %24 = arith.subf %22, %23 : vector<1x128xf32>
      %25 = arith.index_cast %arg1 : i32 to index
      %c0_10 = arith.constant 0 : index
      %c0_11 = arith.constant 0 : index
      %26 = vector.load %arg7[%25, %c0_10, %c0_11] : memref<2x8x128xf32, #tpu.memory_space<vmem>>, vector<1x8x128xf32>
      %27 = vector.shape_cast %26 : vector<1x8x128xf32> to vector<8x128xf32>
      %28 = vector.broadcast %21 : vector<1x128xf32> to vector<8x128xf32>
      %29 = arith.mulf %27, %28 : vector<8x128xf32>
      %30 = vector.broadcast %24 : vector<1x128xf32> to vector<8x128xf32>
      %31 = arith.addf %29, %30 : vector<8x128xf32>
      %32 = arith.index_cast %arg1 : i32 to index
      %c0_12 = arith.constant 0 : index
      %c0_13 = arith.constant 0 : index
      %33 = vector.load %arg7[%32, %c0_12, %c0_13] : memref<2x8x128xf32, #tpu.memory_space<vmem>>, vector<1x8x128xf32>
      %34 = vector.shape_cast %33 : vector<1x8x128xf32> to vector<8x128xf32>
      %35 = vector.shape_cast %31 : vector<8x128xf32> to vector<1x8x128xf32>
      tpu.vector_store %arg7[%32, %c0_12, %c0_13], %35 {strides = array<i32>} : memref<2x8x128xf32, #tpu.memory_space<vmem>>, vector<1x8x128xf32>,
      %36 = arith.truncf %31 : vector<8x128xf32> to vector<8x128xbf16>
      %c0_14 = arith.constant 0 : index
      %c0_15 = arith.constant 0 : index
      %37 = vector.load %arg4[%c0_14, %c0_15] : memref<128x128xbf16, #tpu.memory_space<vmem>>, vector<128x128xbf16>
      %cst_16 = arith.constant dense<0.000000e+00> : vector<8x128xf32>
      %38 = tpu.matmul %36, %37, %cst_16 {dimension_numbers = #tpu.dot_dimension_numbers<[1], [0], [0], [1], [0, 0, 1, 1], [], []>} : vector<8x128xbf16>, vector<128x128xbf16>, vector<8x128xf32> -> vector<8x128xf32>
      %c3 = arith.constant 3 : index
      %c0_17 = arith.constant 0 : index
      %39 = vector.load %arg5[%c3, %c0_17] : memref<8x128xf32, #tpu.memory_space<vmem>>, vector<1x128xf32>
      %40 = vector.broadcast %39 : vector<1x128xf32> to vector<8x128xf32>
      %41 = arith.addf %38, %40 : vector<8x128xf32>
      %cst_18 = arith.constant 0.000000e+00 : f32
      %42 = vector.broadcast %cst_18 : f32 to vector<8x128xf32>
      %43 = arith.maximumf %41, %42 : vector<8x128xf32>
      %c2_19 = arith.constant 2 : index
      %c0_20 = arith.constant 0 : index
      %44 = vector.load %arg8[%c2_19, %c0_20] : memref<4x128xf32, #tpu.memory_space<vmem>>, vector<1x128xf32>
      %cst_21 = arith.constant dense<0.000000e+00> : vector<128xf32>
      %45 = vector.multi_reduction <add>, %43, %cst_21 [0] : vector<8x128xf32> to vector<128xf32>
      %46 = vector.shape_cast %45 : vector<128xf32> to vector<1x128xf32>
      %47 = arith.addf %44, %46 : vector<1x128xf32>
      %c2_22 = arith.constant 2 : index
      %c0_23 = arith.constant 0 : index
      %48 = vector.load %arg8[%c2_22, %c0_23] : memref<4x128xf32, #tpu.memory_space<vmem>>, vector<1x128xf32>
      tpu.vector_store %arg8[%c2_22, %c0_23], %47 {strides = array<i32>} : memref<4x128xf32, #tpu.memory_space<vmem>>, vector<1x128xf32>,
      %c3_24 = arith.constant 3 : index
      %c0_25 = arith.constant 0 : index
      %49 = vector.load %arg8[%c3_24, %c0_25] : memref<4x128xf32, #tpu.memory_space<vmem>>, vector<1x128xf32>
      %50 = arith.mulf %43, %43 : vector<8x128xf32>
      %cst_26 = arith.constant dense<0.000000e+00> : vector<128xf32>
      %51 = vector.multi_reduction <add>, %50, %cst_26 [0] : vector<8x128xf32> to vector<128xf32>
      %52 = vector.shape_cast %51 : vector<128xf32> to vector<1x128xf32>
      %53 = arith.addf %49, %52 : vector<1x128xf32>
      %c3_27 = arith.constant 3 : index
      %c0_28 = arith.constant 0 : index
      %54 = vector.load %arg8[%c3_27, %c0_28] : memref<4x128xf32, #tpu.memory_space<vmem>>, vector<1x128xf32>
      tpu.vector_store %arg8[%c3_27, %c0_28], %53 {strides = array<i32>} : memref<4x128xf32, #tpu.memory_space<vmem>>, vector<1x128xf32>,
    } else {
    }
    %c2_i32 = arith.constant 2 : i32
    %6 = arith.cmpi eq, %arg0, %c2_i32 : i32
    %7 = arith.extui %6 : i1 to i32
    %c0_i32_2 = arith.constant 0 : i32
    %8 = arith.cmpi ne, %7, %c0_i32_2 : i32
    scf.if %8 {
      %c2 = arith.constant 2 : index
      %c0 = arith.constant 0 : index
      %9 = vector.load %arg8[%c2, %c0] : memref<4x128xf32, #tpu.memory_space<vmem>>, vector<1x128xf32>
      %cst = arith.constant 6.250000e-02 : f32
      %10 = vector.broadcast %cst : f32 to vector<1x128xf32>
      %11 = arith.mulf %9, %10 : vector<1x128xf32>
      %c3 = arith.constant 3 : index
      %c0_3 = arith.constant 0 : index
      %12 = vector.load %arg8[%c3, %c0_3] : memref<4x128xf32, #tpu.memory_space<vmem>>, vector<1x128xf32>
      %cst_4 = arith.constant 6.250000e-02 : f32
      %13 = vector.broadcast %cst_4 : f32 to vector<1x128xf32>
      %14 = arith.mulf %12, %13 : vector<1x128xf32>
      %15 = arith.mulf %11, %11 : vector<1x128xf32>
      %16 = arith.subf %14, %15 : vector<1x128xf32>
      %c4 = arith.constant 4 : index
      %c0_5 = arith.constant 0 : index
      %17 = vector.load %arg5[%c4, %c0_5] : memref<8x128xf32, #tpu.memory_space<vmem>>, vector<1x128xf32>
      %cst_6 = arith.constant 9.99999974E-6 : f32
      %18 = vector.broadcast %cst_6 : f32 to vector<1x128xf32>
      %19 = arith.addf %16, %18 : vector<1x128xf32>
      %20 = math.rsqrt %19 : vector<1x128xf32>
      %21 = arith.mulf %17, %20 : vector<1x128xf32>
      %c5 = arith.constant 5 : index
      %c0_7 = arith.constant 0 : index
      %22 = vector.load %arg5[%c5, %c0_7] : memref<8x128xf32, #tpu.memory_space<vmem>>, vector<1x128xf32>
      %23 = arith.mulf %11, %21 : vector<1x128xf32>
      %24 = arith.subf %22, %23 : vector<1x128xf32>
      %25 = arith.index_cast %arg1 : i32 to index
      %c0_8 = arith.constant 0 : index
      %c0_9 = arith.constant 0 : index
      %26 = vector.load %arg7[%25, %c0_8, %c0_9] : memref<2x8x128xf32, #tpu.memory_space<vmem>>, vector<1x8x128xf32>
      %27 = vector.shape_cast %26 : vector<1x8x128xf32> to vector<8x128xf32>
      %28 = arith.truncf %27 : vector<8x128xf32> to vector<8x128xbf16>
      %c0_10 = arith.constant 0 : index
      %c0_11 = arith.constant 0 : index
      %29 = vector.load %arg4[%c0_10, %c0_11] : memref<128x128xbf16, #tpu.memory_space<vmem>>, vector<128x128xbf16>
      %cst_12 = arith.constant dense<0.000000e+00> : vector<8x128xf32>
      %30 = tpu.matmul %28, %29, %cst_12 {dimension_numbers = #tpu.dot_dimension_numbers<[1], [0], [0], [1], [0, 0, 1, 1], [], []>} : vector<8x128xbf16>, vector<128x128xbf16>, vector<8x128xf32> -> vector<8x128xf32>
      %c3_13 = arith.constant 3 : index
      %c0_14 = arith.constant 0 : index
      %31 = vector.load %arg5[%c3_13, %c0_14] : memref<8x128xf32, #tpu.memory_space<vmem>>, vector<1x128xf32>
      %32 = vector.broadcast %31 : vector<1x128xf32> to vector<8x128xf32>
      %33 = arith.addf %30, %32 : vector<8x128xf32>
      %cst_15 = arith.constant 0.000000e+00 : f32
      %34 = vector.broadcast %cst_15 : f32 to vector<8x128xf32>
      %35 = arith.maximumf %33, %34 : vector<8x128xf32>
      %36 = vector.broadcast %21 : vector<1x128xf32> to vector<8x128xf32>
      %37 = arith.mulf %35, %36 : vector<8x128xf32>
      %38 = vector.broadcast %24 : vector<1x128xf32> to vector<8x128xf32>
      %39 = arith.addf %37, %38 : vector<8x128xf32>
      %c6 = arith.constant 6 : index
      %c0_16 = arith.constant 0 : index
      %40 = vector.load %arg5[%c6, %c0_16] : memref<8x128xf32, #tpu.memory_space<vmem>>, vector<1x128xf32>
      %41 = vector.broadcast %40 : vector<1x128xf32> to vector<8x128xf32>
      %42 = arith.mulf %39, %41 : vector<8x128xf32>
      %cst_17 = arith.constant dense<0.000000e+00> : vector<8xf32>
      %43 = vector.multi_reduction <add>, %42, %cst_17 [1] : vector<8x128xf32> to vector<8xf32>
      %44 = vector.shape_cast %43 : vector<8xf32> to vector<8x1xf32>
      %c7 = arith.constant 7 : index
      %c0_18 = arith.constant 0 : index
      %45 = vector.load %arg5[%c7, %c0_18] : memref<8x128xf32, #tpu.memory_space<vmem>>, vector<1x1xf32>
      %46 = vector.broadcast %45 : vector<1x1xf32> to vector<8x1xf32>
      %47 = arith.addf %44, %46 : vector<8x1xf32>
      %c0_19 = arith.constant 0 : index
      %c0_20 = arith.constant 0 : index
      %48 = vector.load %arg6[%c0_19, %c0_20] : memref<8x1xf32, #tpu.memory_space<vmem>>, vector<8x1xf32>
      tpu.vector_store %arg6[%c0_19, %c0_20], %47 {strides = array<i32>} : memref<8x1xf32, #tpu.memory_space<vmem>>, vector<8x1xf32>,
    } else {
    }
    return
  }
  func.func @transform_0(%arg0: i32, %arg1: i32) -> (i32, i32) {
    %c0_i32 = arith.constant 0 : i32
    %0 = arith.cmpi eq, %arg0, %c0_i32 : i32
    %c1_i32 = arith.constant 1 : i32
    %1 = arith.select %0, %arg1, %c1_i32 : i32
    %c0_i32_0 = arith.constant 0 : i32
    %c0_i32_1 = arith.constant 0 : i32
    return %1, %c0_i32_0 : i32, i32
  }
  func.func @transform_1(%arg0: i32, %arg1: i32) -> (i32, i32) {
    %c0_i32 = arith.constant 0 : i32
    %c0_i32_0 = arith.constant 0 : i32
    %c0_i32_1 = arith.constant 0 : i32
    return %c0_i32, %c0_i32_0 : i32, i32
  }
  func.func @transform_2(%arg0: i32, %arg1: i32) -> (i32, i32) {
    %c0_i32 = arith.constant 0 : i32
    %c0_i32_0 = arith.constant 0 : i32
    %c0_i32_1 = arith.constant 0 : i32
    return %c0_i32, %c0_i32_0 : i32, i32
  }
  func.func @transform_3(%arg0: i32, %arg1: i32) -> (i32, i32) {
    %c0_i32 = arith.constant 0 : i32
    %c0_i32_0 = arith.constant 0 : i32
    %c0_i32_1 = arith.constant 0 : i32
    return %c0_i32, %c0_i32_0 : i32, i32
  }
  func.func @transform_4(%arg0: i32, %arg1: i32) -> (i32, i32) {
    %c2_i32 = arith.constant 2 : i32
    %0 = arith.cmpi eq, %arg0, %c2_i32 : i32
    %c0_i32 = arith.constant 0 : i32
    %1 = arith.select %0, %arg1, %c0_i32 : i32
    %c0_i32_0 = arith.constant 0 : i32
    %c0_i32_1 = arith.constant 0 : i32
    return %1, %c0_i32_0 : i32, i32
  }
}

</mosaic_0001>

<bundles_post_ra>
// kernel: tpu_custom_call.1
= control target key start
LH: loop header
LB: loop body
LE: loop exit
PB: predicated region body
PF: predicated region fallthrough
CT: control target
= control target key end

     0   :  { %9 = vsyncpa [#allocation5], 0  ;;  %s2310_s0 = inlined_call_operand.hbm [shape: f32[16,1280], index: 0, kind: input, shape index: {}]   ;;  %s2311_s1 = inlined_call_operand.hbm [shape: bf16[1024,128], index: 1, kind: input, shape index: {}]   ;;  %s2312_s2 = inlined_call_operand.hbm [shape: bf16[128,128], index: 2, kind: input, shape index: {}]   ;;  %s2313_s3 = inlined_call_operand.vmem [shape: f32[8,128], index: 3, kind: input, shape index: {}]   ;;  %s2314_s4 = inlined_call_operand.vmem [shape: f32[16,1], index: 4, kind: output, shape index: {}]  }
   0x1   :  { %11 = vsyncpa [#allocation5 + $0x1], 0 }
   0x2   :  { %12 = vsyncpa [#allocation7], 0  ;;  %s2054_s15 = smov 0   ;;  %s2056_s16 = smov 0  }
   0x3   :  { %s2058_s17 = smov 0   ;;  %s2060_s18 = smov 0  }
   0x4   :  { %s2062_s19 = smov 0   ;;  %s2064_s20 = smov 0  }
   0x5   :  { %s2066_s21 = smov 0   ;;  %s2068_s22 = smov 0  }
   0x6 LB: > { %s1424_s23 = sadd.s32 4294967295, %s2017_s22   ;;  %p54_p0 = scmp.ne.s32.totalorder %s1993_s16, %s1989_s15  ;;  %s2017_s22 = sphi %s2068_s22, %s18_s22   ;;  %s2013_s21 = sphi %s2066_s21, %s2333_s21   ;;  %s2009_s20 = sphi %s2064_s20, %s2332_s20   ;;  %s2005_s19 = sphi %s2062_s19, %s2331_s19   ;;  %s2001_s18 = sphi %s2060_s18, %s2330_s18   ;;  %s1997_s17 = sphi %s2058_s17, %s2329_s17   ;;  %s1993_s16 = sphi %s2056_s16, %s2328_s16   ;;  %s1989_s15 = sphi %s2054_s15, %s2327_s15  }
   0x7   : > { %p2094_p1 = scmp.eq.s32.totalorder %s1424_s23, 0  ;;  %p1426_p2 = scmp.ge.s32.totalorder %s2017_s22, 1 }
   0x8   : > { %p158_p3 = scmp.lt.s32.totalorder %s2017_s22, 7  ;;  %s2019_s27 = smov [#allocation6]  }
   0x9   : > { %s2319_s24 = scalar_select %p2094_p1, 1, 0 }
   0xa   : > { %p2102_p4 = por %p2094_p1, %p54_p0  ;;  %p2106_p5 = pnand %p1426_p2, %p158_p3 }
   0xb   : > { %s170_s28 = sshll.u32 %s2019_s27, 4  ;;  %s2020_s30 = smov [#allocation8]   ;;  %s171_s28 = int_to_ptr.vmem [resolvable:$true] %s170_s28 }
   0xc   : > { %s2320_s25 = scalar_select %p2102_p4, 1, 0 }
   0xd   : > { %s2321_s26 = scalar_select %p2106_p5, 1, 0 }
   0xe   : > { %p1688_p6 = pneg %p2106_p5  ;;  %s183_s5 = sshll.u32 %s2020_s30, 4  ;;  %s2118_s5 = int_to_ptr.vmem [resolvable:$true] %s183_s5 }
   0xf   : > { %s1861_s8 = scalar_lea.hbm %s2311_s1, 8192 }
  0x10   : > { %p2114_p7 = pnand %p1688_p6, %p2094_p1  ;;  %p1862_p8 = scmp.ne.s32.totalorder %s2311_s1, %s1861_s8 }
  0x11   : > { %p1868_p12 = scmp.lt.u32.totalorder %s1861_s8, %s2311_s1 }
  0x12   : > { %p1863_p9 = pneg %p2114_p7 }
  0x14   : > { %p1864_p10 = pnand %p1863_p9, %p1862_p8 }
  0x16   : > { %p1865_p11 = pneg %p1864_p10 }
  0x18   : > { %p1870_p13 = pnand %p1868_p12, %p1865_p11 }
  0x1a   : > { %1873 = shalt.err (!%p1870_p13)
}
  0x1b   : > { %s1874_s13 = scalar_lea.vmem %s171_s28, 8192  ;;  %p1882_p6 = scmp.lt.s32.totalorder %s171_s28, %s171_s28 }
  0x1c   : > { %p1875_p0 = scmp.ne.s32.totalorder %s171_s28, %s1874_s13  ;;  %p1883_p1 = scmp.lt.s32.totalorder %s1874_s13, %s1874_s13 }
  0x1e   : > { %p1877_p2 = pnand %p1875_p0, %p1863_p9  ;;  %p1884_p4 = por %p1883_p1, %p1882_p6 }
  0x20   : > { %p1878_p3 = pneg %p1877_p2 }
  0x22   : > { %p1885_p5 = pnand %p1884_p4, %p1878_p3 }
  0x24   : > { %1888 = shalt.err (!%p1885_p5)
}
  0x25   : > { %s2021_s14 = smov 64   ;;  %s2022_s15 = smov 4  }
  0x26   : > { %1691 = dma.hbm_to_vmem [thread:$0]  (!%p2114_p7), %s2311_s1, 8192, %s171_s28, [#allocation7], %s2021_s14, %s2021_s14, %s2022_s15  }
  0x27   : > { %s1889_s7 = scalar_lea.hbm %s2312_s2, 1024 }
  0x28   : > { %p1890_p8 = scmp.ne.s32.totalorder %s2312_s2, %s1889_s7  ;;  %p1896_p5 = scmp.lt.u32.totalorder %s1889_s7, %s2312_s2 }
  0x2a   : > { %p1892_p1 = pnand %p1890_p8, %p1863_p9 }
  0x2c   : > { %p1893_p4 = pneg %p1892_p1 }
  0x2e   : > { %p1898_p10 = pnand %p1896_p5, %p1893_p4 }
  0x30   : > { %1901 = shalt.err (!%p1898_p10)
}
  0x31   : > { %s1902_s28 = scalar_lea.vmem %s2118_s5, 1024  ;;  %p1910_p0 = scmp.lt.s32.totalorder %s2118_s5, %s2118_s5 }
  0x32   : > { %p1903_p11 = scmp.ne.s32.totalorder %s2118_s5, %s1902_s28  ;;  %p1911_p2 = scmp.lt.s32.totalorder %s1902_s28, %s1902_s28 }
  0x34   : > { %p1905_p12 = pnand %p1903_p11, %p1863_p9  ;;  %p1912_p3 = por %p1911_p2, %p1910_p0 }
  0x36   : > { %p1906_p13 = pneg %p1905_p12 }
  0x38   : > { %p1913_p6 = pnand %p1912_p3, %p1906_p13 }
  0x3a   : > { %1916 = shalt.err (!%p1913_p6)
}
  0x3b   : > { %1694 = dma.hbm_to_vmem [thread:$0]  (!%p2114_p7), %s2312_s2, 1024, %s2118_s5, [#allocation7], %s2021_s14, %s2021_s14, %s2022_s15  }
  0x3c   : > { %s27_s23 = sadd.s32 1, %s2009_s20  ;;  %s30_s27 = sadd.s32 1, %s2013_s21 }
  0x3d   : > { %p28_p9 = scmp.ge.s32.totalorder %s27_s23, 2  ;;  %p34_p8 = scmp.eq.s32.totalorder %s2013_s21, 0 }
  0x3e   : > { %p48_p1 = scmp.ne.s32.totalorder %s1997_s17, %s1993_s16  ;;  %p49_p5 = scmp.eq.s32.totalorder %s2017_s22, 0 }
  0x3f   : > { %s2335_s23 = smov (%p28_p9, %s27_s23), 0  ;;  %s2337_s27 = smov (!%p28_p9, %s30_s27), %s2013_s21 }
  0x40   : > { %s35_s29 = scalar_select %p34_p8, %s2009_s20, 1 }
  0x41   : > { %p32_p4 = scmp.ge.s32.totalorder %s2337_s27, 3  ;;  %s200_s30 = sand.u32 1, %s1997_s17  }
  0x42   : > { %p50_p10 = por %p49_p5, %p48_p1  ;;  %p1701_p7 = scmp.lt.s32.totalorder %s2017_s22, 6 }
  0x43   : > { %s2339_s27 = smov (%p32_p4, %s2337_s27), 0  ;;  %s1430_s5 = sshll.u32 %s200_s30, 6 }
  0x44   : > { %p36_p11 = scmp.eq.s32.totalorder %s2339_s27, 0  ;;  %s1677_s14 = smul.u32 1280, %s35_s29 }
  0x45   : > { %s41_s6 = sadd.s32 1, %s1997_s17  ;;  %s204_s7 = scalar_lea.vmem [#allocation4], %s1430_s5 }
  0x46   : > { %s37_s15 = scalar_select %p36_p11, %s2335_s23, 1 }
  0x47   : > { %s214_s8 = sshll.u32 %s204_s7, 4  ;;  %p2184_p13 = pnand %p1701_p7, %p50_p10  ;;  %s2193_s8 = int_to_ptr.vmem [resolvable:$true] %s214_s8 }
  0x48   : > { %s38_s9 = ssub.s32 %s35_s29, %s37_s15  ;;  %s2191_s12 = scalar_lea.hbm %s2310_s0, %s1677_s14 }
  0x49   : > { %p39_p12 = scmp.eq.s32.totalorder %s38_s9, 0  ;;  %s201_s29 = scalar_lea.sflag [#allocation5], %s200_s30 }
  0x4a   : > { %s1917_s5 = scalar_lea.hbm %s2191_s12, 1024  ;;  %p1919_p2 = pneg %p2184_p13 }
  0x4b   : > { %s2196_s13 = scalar_select %p39_p12, %s1997_s17, %s41_s6  }
  0x4c   : > { %p1918_p0 = scmp.ne.s32.totalorder %s2191_s12, %s1917_s5  ;;  %s1922_s7 = scalar_lea.hbm %s2310_s0, 2560 }
  0x4d   : > { %p1923_p9 = scmp.lt.u32.totalorder %s2191_s12, %s2310_s0  ;;  %p1924_p8 = scmp.lt.u32.totalorder %s1922_s7, %s1917_s5 }
  0x4e   : > { %p1920_p3 = pnand %p1919_p2, %p1918_p0  ;;  %p1926_p4 = scmp.lt.u32.totalorder %s1917_s5, %s2191_s12 }
  0x4f   : > { %p1925_p1 = por %p1924_p8, %p1923_p9 }
  0x50   : > { %p1921_p6 = pneg %p1920_p3 }
  0x51   : > { %p1927_p5 = por %p1926_p4, %p1925_p1 }
  0x53   : > { %p1928_p10 = pnand %p1927_p5, %p1921_p6 }
  0x55   : > { %1931 = shalt.err (!%p1928_p10)
}
  0x56   : > { %s1932_s30 = scalar_lea.vmem %s2193_s8, 1024  ;;  %s2023_s6 = smov [#allocation4]  }
  0x57   : > { %p1933_p7 = scmp.ne.s32.totalorder %s2193_s8, %s1932_s30  ;;  %s1937_s28 = sshll.u32 %s2023_s6, 4  ;;  %s1938_s28 = int_to_ptr.vmem [resolvable:$false] %s1937_s28 }
  0x58   : > { %s1939_s15 = scalar_lea.vmem %s1938_s28, 2048  ;;  %p1940_p0 = scmp.lt.s32.totalorder %s2193_s8, %s1938_s28 }
  0x59   : > { %p1935_p11 = pnand %p1933_p7, %p1919_p2  ;;  %p1941_p3 = scmp.lt.s32.totalorder %s1939_s15, %s1932_s30 }
  0x5b   : > { %p1936_p12 = pneg %p1935_p11  ;;  %p1942_p9 = por %p1941_p3, %p1940_p0 }
  0x5d   : > { %p1943_p8 = pnand %p1942_p9, %p1936_p12 }
  0x5f   : > { %1946 = shalt.err (!%p1943_p8)
}
  0x60   : > { %1698 = dma.hbm_to_vmem [thread:$0]  (!%p2184_p13), %s2191_s12, 1024, %s2193_s8, %s201_s29  }
  0x61   : > { %p2324_p6 = scmp.ne.s32.totalorder %s2321_s26, 0 }
  0x62   : > { %s225_s5 = sand.u32 (!%p2324_p6), 1, %s1993_s16   ;;  %p2325_p2 = scmp.ne.s32.totalorder (!%p2324_p6), %s2320_s25, 0 }
  0x63   : > { %223 = sbr.rel (%p2324_p6) target bundleno = 1101 (0x44d), region = 36  ;;  %s1433_s14 = sshll.u32 (!%p2324_p6), %s225_s5, 6 }
  0x64   : > { %s226_s7 = scalar_lea.sflag (!%p2324_p6), [#allocation5], %s225_s5  ;;  %s2226_s9 = scalar_lea.vmem (!%p2324_p6), [#allocation4], %s1433_s14 }
  0x6a   : > { %1980 = dma.done.wait (%p2325_p2), %s226_s7, 1024  }
  0x6b   : > { %1982 = vsyncadd (%p2325_p2), %s226_s7, 4294966272  ;;  %p2326_p1 = scmp.ne.s32.totalorder %s2319_s24, 0 }
  0x6d   : > { %1984 = dma.done.wait (%p2326_p1), [#allocation7], 9216  }
  0x6e   : > { %1986 = vsyncadd (%p2326_p1), [#allocation7], 4294958080  ;;  %p265_p13 = scmp.eq.s32.totalorder %s2005_s19, 2  ;;  %p1437_p5 = scmp.ne.s32.totalorder %s2005_s19, 0 }
  0x6f   : > { %p1438_p10 = scmp.ne.s32.totalorder (!%p1437_p5), %s2001_s18, 0 }
  0x70   : > { %s266_s26 = scalar_select %p265_p13, %s2001_s18, 0 }
  0x71   : > { %277 = sbr.rel (%p1437_p5) target bundleno = 431 (0x1af), region = 52 }
  0x72   : > { %p267_p4 = scmp.lt.s32.totalorder %s266_s26, 1 }
  0x74   : > { %s2341_s26 = smov (!%p267_p4, %s266_s26), 1 }
  0x75   : > { %s1436_s8 = sshll.u32 %s2341_s26, 3 }
  0x76   : > { %s2241_s29 = scalar_lea.vmem %s2314_s4, %s1436_s8 }
  0x78   : > { %281 = sbr.rel (%p1438_p10) target bundleno = 127 (0x7f), region = 56  ;;  %v2024_v0 = vmov (!%p1438_p10), 0.0  }
  0x79   : > { %282 = vst [vmem:[#allocation3] sm:$0xf] (!%p1438_p10), %v2024_v0 }
  0x7f PF: > { %v1777_v1 = vld [vmem:[#allocation6 + $0x40] sm:$0xff]   ;;  %v1781_v5 = vld [vmem:[#allocation6 + $0x48] sm:$0xff]   ;;  %v1785_v9 = vld [vmem:[#allocation6 + $0x50] sm:$0xff]   ;;  %s1504_s11 = sshll.u32 %s2001_s18, 3 }
  0x80   : > { %v1778_v2 = vld [vmem:[#allocation6 + $0xc0] sm:$0xff]   ;;  %1531 = vmatprep.subr.bf16.mxu0 %v1777_v1  ;;  %v1782_v6 = vld [vmem:[#allocation6 + $0xc8] sm:$0xff]   ;;  %v1786_v10 = vld [vmem:[#allocation6 + $0xd0] sm:$0xff]   ;;  %s978_s30 = scalar_lea.vmem [#allocation2], %s1504_s11 }
  0x81   : > { %v1779_v3 = vld [vmem:[#allocation6] sm:$0xff]   ;;  %1553 = vmatprep.subr.bf16.mxu1 %v1778_v2  ;;  %v1783_v7 = vld [vmem:[#allocation6 + $0x8] sm:$0xff]   ;;  %v1787_v11 = vld [vmem:[#allocation6 + $0x10] sm:$0xff]  }
  0x82   : > { %v1780_v4 = vld [vmem:[#allocation6 + $0x80] sm:$0xff]   ;;  %1532 = vmatpush3.bf16.msra.mxu0 %v1779_v3  ;;  %v1784_v8 = vld [vmem:[#allocation6 + $0x88] sm:$0xff]   ;;  %v1788_v12 = vld [vmem:[#allocation6 + $0x90] sm:$0xff]  }
  0x83   : > { %1554 = vmatpush3.bf16.msra.mxu1 %v1780_v4  ;;  %1533 = vmatprep.subr.bf16.mxu0 %v1781_v5  ;;  %v1789_v13 = vld [vmem:[#allocation6 + $0x58] sm:$0xff]   ;;  %v1793_v17 = vld [vmem:[#allocation6 + $0x60] sm:$0xff]   ;;  %v1797_v21 = vld [vmem:[#allocation6 + $0x68] sm:$0xff]  }
  0x84   : > { %1555 = vmatprep.subr.bf16.mxu1 %v1782_v6  ;;  %v1790_v14 = vld [vmem:[#allocation6 + $0xd8] sm:$0xff]   ;;  %v1794_v18 = vld [vmem:[#allocation6 + $0xe0] sm:$0xff]   ;;  %v1798_v22 = vld [vmem:[#allocation6 + $0xe8] sm:$0xff]  }
  0x85   : > { %v1791_v15 = vld [vmem:[#allocation6 + $0x18] sm:$0xff]   ;;  %v1795_v19 = vld [vmem:[#allocation6 + $0x20] sm:$0xff]   ;;  %v1799_v23 = vld [vmem:[#allocation6 + $0x28] sm:$0xff]  }
  0x86   : > { %1534 = vmatpush3.bf16.msra.mxu0 %v1783_v7  ;;  %v1792_v16 = vld [vmem:[#allocation6 + $0x98] sm:$0xff]   ;;  %v1796_v20 = vld [vmem:[#allocation6 + $0xa0] sm:$0xff]   ;;  %v1800_v24 = vld [vmem:[#allocation6 + $0xa8] sm:$0xff]  }
  0x87   : > { %1556 = vmatpush3.bf16.msra.mxu1 %v1784_v8  ;;  %1535 = vmatprep.subr.bf16.mxu0 %v1785_v9  ;;  %v1801_v25 = vld [vmem:[#allocation6 + $0x70] sm:$0xff]   ;;  %v1805_v29 = vld [vmem:[#allocation6 + $0x78] sm:$0xff]   ;;  %v284_v33 = vld [vmem:[%s2226_s9 + $0x8] sm:$0xff] }
  0x88   : > { %1557 = vmatprep.subr.bf16.mxu1 %v1786_v10  ;;  %v1802_v26 = vld [vmem:[#allocation6 + $0xf0] sm:$0xff]   ;;  %v1806_v30 = vld [vmem:[#allocation6 + $0xf8] sm:$0xff]   ;;  %v283_v35 = vld [vmem:[%s2226_s9] sm:$0xff]  ;;  %v292_v36 = vpack.c.bf16 %v284_v33, %v284_v33 }
  0x89   : > { %v1803_v27 = vld [vmem:[#allocation6 + $0x30] sm:$0xff]   ;;  %v1807_v31 = vld [vmem:[#allocation6 + $0x38] sm:$0xff]   ;;  %v291_v38 = vpack.c.bf16 %v283_v35, %v283_v35  ;;  %v1809_v41 = vld [vmem:[#allocation6 + $0x140] sm:$0xff]  }
  0x8a   : > { %1536 = vmatpush3.bf16.msra.mxu0 %v1787_v11  ;;  %v1804_v28 = vld [vmem:[#allocation6 + $0xb0] sm:$0xff]   ;;  %v1808_v32 = vld [vmem:[#allocation6 + $0xb8] sm:$0xff]   ;;  %848 = vmatprep.mubr.bf16.mxu0 %v292_v36  ;;  %v1810_v42 = vld [vmem:[#allocation6 + $0x1c0] sm:$0xff]  }
  0x8b   : > { %1558 = vmatpush3.bf16.msra.mxu1 %v1788_v12  ;;  %1537 = vmatprep.subr.bf16.mxu0 %v1789_v13  ;;  %v286_v34 = vld [vmem:[%s2226_s9 + $0x18] sm:$0xff]  ;;  %v285_v39 = vld [vmem:[%s2226_s9 + $0x10] sm:$0xff]  ;;  %v1811_v43 = vld [vmem:[#allocation6 + $0x100] sm:$0xff]  }
  0x8c   : > { %1559 = vmatprep.subr.bf16.mxu1 %v1790_v14  ;;  %v294_v37 = vpack.c.bf16 %v286_v34, %v286_v34  ;;  %v293_v40 = vpack.c.bf16 %v285_v39, %v285_v39  ;;  %v1812_v44 = vld [vmem:[#allocation6 + $0x180] sm:$0xff]   ;;  %v1813_v45 = vld [vmem:[#allocation6 + $0x148] sm:$0xff]   ;;  %v1817_v49 = vld [vmem:[#allocation6 + $0x150] sm:$0xff]  }
  0x8d   : > { %v1814_v46 = vld [vmem:[#allocation6 + $0x1c8] sm:$0xff]   ;;  %v1818_v50 = vld [vmem:[#allocation6 + $0x1d0] sm:$0xff]   ;;  %v1821_v53 = vld [vmem:[#allocation6 + $0x158] sm:$0xff]  }
  0x8e   : > { %1538 = vmatpush3.bf16.msra.mxu0 %v1791_v15  ;;  %888 = vmatprep.mubr.bf16.mxu1 %v294_v37  ;;  %v1815_v47 = vld [vmem:[#allocation6 + $0x108] sm:$0xff]   ;;  %v1819_v51 = vld [vmem:[#allocation6 + $0x110] sm:$0xff]   ;;  %v1822_v54 = vld [vmem:[#allocation6 + $0x1d8] sm:$0xff]  }
  0x8f   : > { %1560 = vmatpush3.bf16.msra.mxu1 %v1792_v16  ;;  %1539 = vmatprep.subr.bf16.mxu0 %v1793_v17  ;;  %v1816_v48 = vld [vmem:[#allocation6 + $0x188] sm:$0xff]   ;;  %v1820_v52 = vld [vmem:[#allocation6 + $0x190] sm:$0xff]   ;;  %v1823_v55 = vld [vmem:[#allocation6 + $0x118] sm:$0xff]  }
  0x90   : > { %1561 = vmatprep.subr.bf16.mxu1 %v1794_v18  ;;  %v1824_v56 = vld [vmem:[#allocation6 + $0x198] sm:$0xff]   ;;  %v1825_v57 = vld [vmem:[#allocation6 + $0x160] sm:$0xff]   ;;  %v1829_v61 = vld [vmem:[#allocation6 + $0x168] sm:$0xff]  }
  0x91   : > { %v1826_v58 = vld [vmem:[#allocation6 + $0x1e0] sm:$0xff]   ;;  %v1830_v62 = vld [vmem:[#allocation6 + $0x1e8] sm:$0xff]   ;;  %v1833_v1 = vld [vmem:[#allocation6 + $0x170] sm:$0xff]  }
  0x92   : > { %1540 = vmatpush3.bf16.msra.mxu0 %v1795_v19  ;;  %v1827_v59 = vld [vmem:[#allocation6 + $0x120] sm:$0xff]   ;;  %v1831_v63 = vld [vmem:[#allocation6 + $0x128] sm:$0xff]   ;;  %v1834_v2 = vld [vmem:[#allocation6 + $0x1f0] sm:$0xff]  }
  0x93   : > { %1562 = vmatpush3.bf16.msra.mxu1 %v1796_v20  ;;  %1541 = vmatprep.subr.bf16.mxu0 %v1797_v21  ;;  %v1828_v60 = vld [vmem:[#allocation6 + $0x1a0] sm:$0xff]   ;;  %v1832_v0 = vld [vmem:[#allocation6 + $0x1a8] sm:$0xff]   ;;  %v1835_v3 = vld [vmem:[#allocation6 + $0x130] sm:$0xff]  }
  0x94   : > { %1563 = vmatprep.subr.bf16.mxu1 %v1798_v22  ;;  %v1836_v4 = vld [vmem:[#allocation6 + $0x1b0] sm:$0xff]   ;;  %v1837_v5 = vld [vmem:[#allocation6 + $0x178] sm:$0xff]   ;;  %v288_v9 = vld [vmem:[%s2226_s9 + $0x28] sm:$0xff] }
  0x95   : > { %v1838_v6 = vld [vmem:[#allocation6 + $0x1f8] sm:$0xff]   ;;  %v296_v11 = vpack.c.bf16 %v288_v9, %v288_v9  ;;  %v287_v13 = vld [vmem:[%s2226_s9 + $0x20] sm:$0xff]  ;;  %v289_v14 = vld [vmem:[%s2226_s9 + $0x30] sm:$0xff] }
  0x96   : > { %1542 = vmatpush3.bf16.msra.mxu0 %v1799_v23  ;;  %v1839_v7 = vld [vmem:[#allocation6 + $0x138] sm:$0xff]   ;;  %v295_v15 = vpack.c.bf16 %v287_v13, %v287_v13  ;;  %v297_v16 = vpack.c.bf16 %v289_v14, %v289_v14  ;;  %v1439_v19 = vld [vmem:[%s2313_s3] ss:$0 sm:$0xff] }
  0x97   : > { %1564 = vmatpush3.bf16.msra.mxu1 %v1800_v24  ;;  %1543 = vmatprep.subr.bf16.mxu0 %v1801_v25  ;;  %v1840_v8 = vld [vmem:[#allocation6 + $0x1b8] sm:$0xff]  }
  0x98   : > { %1565 = vmatprep.subr.bf16.mxu1 %v1802_v26  ;;  %v290_v10 = vld [vmem:[%s2226_s9 + $0x38] sm:$0xff] }
  0x99   : > { %v298_v12 = vpack.c.bf16 %v290_v10, %v290_v10 }
  0x9a   : > { %1544 = vmatpush3.bf16.msra.mxu0 %v1803_v27 }
  0x9b   : > { %1566 = vmatpush3.bf16.msra.mxu1 %v1804_v28  ;;  %1545 = vmatprep.subr.bf16.mxu0 %v1805_v29 }
  0x9c   : > { %1567 = vmatprep.subr.bf16.mxu1 %v1806_v30 }
  0x9e   : > { %1546 = vmatpush3.bf16.msra.mxu0 %v1807_v31 }
  0x9f   : > { %1568 = vmatpush3.bf16.msra.mxu1 %v1808_v32  ;;  %1575 = vmatprep.subr.bf16.mxu0 %v1809_v41 }
  0xa0   : > { %1597 = vmatprep.subr.bf16.mxu1 %v1810_v42 }
  0xa1   : > { %849 = vmatmul.mubr.bf16.vlgmr.msra.gmra.mrb[0].mxu0 %v291_v38 }
  0xa2   : > { %889 = vmatmul.mubr.bf16.vlgmr.msra.gmra.mrb[0].mxu1 %v293_v40  ;;  %1576 = vmatpush3.bf16.msra.mxu0 %v1811_v43 }
  0xa3   : > { %1598 = vmatpush3.bf16.msra.mxu1 %v1812_v44  ;;  %1577 = vmatprep.subr.bf16.mxu0 %v1813_v45 }
  0xa4   : > { %1599 = vmatprep.subr.bf16.mxu1 %v1814_v46  ;;  %928 = vmatprep.mubr.bf16.mxu0 %v296_v11 }
  0xa5   : > { %968 = vmatprep.mubr.bf16.mxu1 %v298_v12 }
  0xa6   : > { %1578 = vmatpush3.bf16.msra.mxu0 %v1815_v47 }
  0xa7   : > { %1600 = vmatpush3.bf16.msra.mxu1 %v1816_v48  ;;  %1579 = vmatprep.subr.bf16.mxu0 %v1817_v49 }
  0xa8   : > { %1601 = vmatprep.subr.bf16.mxu1 %v1818_v50 }
  0xaa   : > { %1580 = vmatpush3.bf16.msra.mxu0 %v1819_v51 }
  0xab   : > { %1602 = vmatpush3.bf16.msra.mxu1 %v1820_v52  ;;  %1581 = vmatprep.subr.bf16.mxu0 %v1821_v53  ;;  %v980_v53 = vld [vmem:[#allocation3] sm:$0x1] }
  0xac   : > { %1603 = vmatprep.subr.bf16.mxu1 %v1822_v54 }
  0xae   : > { %1582 = vmatpush3.bf16.msra.mxu0 %v1823_v55 }
  0xaf   : > { %1604 = vmatpush3.bf16.msra.mxu1 %v1824_v56  ;;  %1583 = vmatprep.subr.bf16.mxu0 %v1825_v57  ;;  %v989_v56 = vld [vmem:[#allocation3 + $0x1] sm:$0x1] }
  0xb0   : > { %1605 = vmatprep.subr.bf16.mxu1 %v1826_v58 }
  0xb2   : > { %1584 = vmatpush3.bf16.msra.mxu0 %v1827_v59 }
  0xb3   : > { %1606 = vmatpush3.bf16.msra.mxu1 %v1828_v60  ;;  %1585 = vmatprep.subr.bf16.mxu0 %v1829_v61 }
  0xb4   : > { %1607 = vmatprep.subr.bf16.mxu1 %v1830_v62 }
  0xb6   : > { %1586 = vmatpush3.bf16.msra.mxu0 %v1831_v63 }
  0xb7   : > { %1608 = vmatpush3.bf16.msra.mxu1 %v1832_v0  ;;  %1587 = vmatprep.subr.bf16.mxu0 %v1833_v1 }
  0xb8   : > { %1609 = vmatprep.subr.bf16.mxu1 %v1834_v2 }
  0xba   : > { %1588 = vmatpush3.bf16.msra.mxu0 %v1835_v3 }
  0xbb   : > { %1610 = vmatpush3.bf16.msra.mxu1 %v1836_v4  ;;  %1589 = vmatprep.subr.bf16.mxu0 %v1837_v5 }
  0xbc   : > { %1611 = vmatprep.subr.bf16.mxu1 %v1838_v6 }
  0xbe   : > { %1590 = vmatpush3.bf16.msra.mxu0 %v1839_v7 }
  0xbf   : > { %1612 = vmatpush3.bf16.msra.mxu1 %v1840_v8 }
  0xc1   : > { %929 = vmatmul.mubr.bf16.vlgmr.msra.gmra.mrb[4].mxu0 %v295_v15 }
  0xc2   : > { %969 = vmatmul.mubr.bf16.vlgmr.msra.gmra.mrb[4].mxu1 %v297_v16 }
 0x174   : > { %v1547_v17 = vpop.f32.mrb[0].mxu0 }
 0x175   : > { %v1569_v18 = vpop.f32.mrb[0].mxu1  ;;  %v1548_v20 = vpop.f32.mrb[1].mxu0 }
 0x176   : > { %v1570_v21 = vpop.f32.mrb[1].mxu1  ;;  %v1549_v22 = vadd.f32 %v1548_v20, %v1547_v17  ;;  %v1550_v24 = vpop.f32.mrb[2].mxu0 }
 0x177   : > { %v1571_v23 = vadd.f32 %v1570_v21, %v1569_v18  ;;  %v1572_v25 = vpop.f32.mrb[2].mxu1  ;;  %v1551_v26 = vpop.f32.mrb[3].mxu0 }
 0x178   : > { %v1573_v27 = vpop.f32.mrb[3].mxu1  ;;  %v851_v28 = vadd.f32 %v1549_v22, %v1439_v19 }
 0x17a   : > { %v891_v29 = vadd.f32 %v1571_v23, %v851_v28 }
 0x194   : > { %v1591_v30 = vpop.f32.mrb[4].mxu0 }
 0x195   : > { %v1613_v31 = vpop.f32.mrb[4].mxu1  ;;  %v1592_v32 = vpop.f32.mrb[5].mxu0 }
 0x196   : > { %v1593_v33 = vadd.f32 %v1592_v32, %v1591_v30  ;;  %v1614_v34 = vpop.f32.mrb[5].mxu1  ;;  %v1594_v35 = vpop.f32.mrb[6].mxu0 }
 0x197   : > { %v1615_v36 = vadd.f32 %v1614_v34, %v1613_v31  ;;  %v1616_v37 = vpop.f32.mrb[6].mxu1  ;;  %v1595_v38 = vpop.f32.mrb[7].mxu0 }
 0x198   : > { %v931_v39 = vadd.f32 %v1593_v33, %v891_v29  ;;  %v1617_v40 = vpop.f32.mrb[7].mxu1 }
 0x19a   : > { %v971_v41 = vadd.f32 %v1615_v36, %v931_v39 }
 0x19c   : > { %v976_v42 = vmax.f32 %v971_v41, 0.0 }
 0x19e   : > { %979 = vst [vmem:[%s978_s30] sm:$0xff] %v976_v42  ;;  %v981_v43 = vrot.slane %v976_v42, 4  ;;  %v990_v44 = vmul.f32 %v976_v42, %v976_v42 }
 0x1a0   : > { %v982_v45 = vadd.f32 %v981_v43, %v976_v42  ;;  %v991_v46 = vrot.slane %v990_v44, 4 }
 0x1a2   : > { %v983_v47 = vrot.slane %v982_v45, 2  ;;  %v992_v48 = vadd.f32 %v991_v46, %v990_v44 }
 0x1a4   : > { %v984_v49 = vadd.f32 %v983_v47, %v982_v45  ;;  %v993_v50 = vrot.slane %v992_v48, 2 }
 0x1a6   : > { %v985_v51 = vrot.slane %v984_v49, 1  ;;  %v994_v52 = vadd.f32 %v993_v50, %v992_v48 }
 0x1a8   : > { %v986_v54 = vadd.f32 %v985_v51, %v984_v49  ;;  %v995_v55 = vrot.slane %v994_v52, 1 }
 0x1aa   : > { %v987_v57 = vadd.f32 %v986_v54, %v980_v53  ;;  %v996_v58 = vadd.f32 %v995_v55, %v994_v52 }
 0x1ac   : > { %988 = vst [vmem:[#allocation3] sm:$0x1] %v987_v57  ;;  %v997_v59 = vadd.f32 %v996_v58, %v989_v56 }
 0x1ae   : > { %998 = vst [vmem:[#allocation3 + $0x1] sm:$0x1] %v997_v59 }
 0x1af PF: > { %p1505_p7 = scmp.ne.s32.totalorder %s2005_s19, 1 }
 0x1b0   : > { %v1841_v60 = vld [vmem:[#allocation8] sm:$0xff] (!%p1505_p7)   ;;  %v2025_v61 = vmov (!%p1505_p7), 0.0   ;;  %v1842_v62 = vld [vmem:[#allocation8 + $0x8] sm:$0xff] (!%p1505_p7)   ;;  %vm2026_vm0 = vmmov (!%p1505_p7), 0   ;;  %v1843_v63 = vld [vmem:[#allocation8 + $0x10] sm:$0xff] (!%p1505_p7)   ;;  %v1019_v10 = vlaneseq (!%p1505_p7)  ;;  %s1506_s6 = sshll.u32 (!%p1505_p7), %s2001_s18, 3 }
 0x1b1   : > { %1002 = sbr.rel (%p1505_p7) target bundleno = 700 (0x2bc), region = 60  ;;  %1637 = vmatprep.subr.bf16.mxu0 (!%p1505_p7), %v2025_v61  ;;  %1653 = vmatprep.mubr.msk.bf16.mxu0 (!%p1505_p7), %vm2026_vm0, %v2025_v61  ;;  %v1844_v4 = vld [vmem:[#allocation8 + $0x18] sm:$0xff] (!%p1505_p7)   ;;  %v1845_v7 = vld [vmem:[#allocation8 + $0x20] sm:$0xff] (!%p1505_p7)   ;;  %v1846_v9 = vld [vmem:[#allocation8 + $0x28] sm:$0xff] (!%p1505_p7)   ;;  %s1017_s7 = scalar_lea.vmem (!%p1505_p7), [#allocation2], %s1506_s6 }
 0x1b2   : > { %1638 = vmatpush3.bf16.msra.mxu0 (!%p1505_p7), %v1841_v60  ;;  %v1847_v11 = vld [vmem:[#allocation8 + $0x30] sm:$0xff] (!%p1505_p7)   ;;  %v1020_v12 = vshrl.u32 (!%p1505_p7), %v1019_v10, 7  ;;  %v1009_v13 = vld [vmem:[%s2313_s3 + $0x1] sm:$0x1] (!%p1505_p7)  ;;  %v1848_v14 = vld [vmem:[#allocation8 + $0x38] sm:$0xff] (!%p1505_p7)  }
 0x1b3   : > { %1639 = vmatprep.subr.bf16.mxu0 (!%p1505_p7), %v2025_v61  ;;  %v1003_v0 = vld [vmem:[#allocation3] sm:$0x1] (!%p1505_p7)  ;;  %v1013_v18 = vld [vmem:[%s2313_s3 + $0x2] sm:$0x1] (!%p1505_p7)  ;;  %v1507_v27 = vld [vmem:[%s2313_s3 + $0x3] ss:$0 sm:$0xff] (!%p1505_p7) }
 0x1b4   : > { %v1004_v2 = vmul.f32 (!%p1505_p7), 0.0625, %v1003_v0  ;;  %v1021_v15 = vsub.s32 (!%p1505_p7), 0, %v1020_v12  ;;  %v1018_v19 = vld [vmem:[%s1017_s7] sm:$0xff] (!%p1505_p7)  ;;  %v1141_v44 = vld [vmem:[#allocation3 + $0x2] sm:$0x1] (!%p1505_p7) }
 0x1b5   : > { %v1005_v1 = vld [vmem:[#allocation3 + $0x1] sm:$0x1] (!%p1505_p7)  ;;  %v1150_v47 = vld [vmem:[#allocation3 + $0x3] sm:$0x1] (!%p1505_p7) }
 0x1b6   : > { %1640 = vmatpush3.bf16.msra.mxu0 (!%p1505_p7), %v1842_v62  ;;  %v1006_v3 = vmul.f32 (!%p1505_p7), 0.0625, %v1005_v1  ;;  %v1007_v5 = vmul.f32 (!%p1505_p7), %v1004_v2, %v1004_v2 }
 0x1b7   : > { %1641 = vmatprep.subr.bf16.mxu0 (!%p1505_p7), %v2025_v61 }
 0x1b8   : > { %v1008_v6 = vsub.f32 %v1006_v3, %v1007_v5 }
 0x1ba   : > { %1642 = vmatpush3.bf16.msra.mxu0 %v1843_v63  ;;  %v1010_v8 = vadd.f32 1e-05, %v1008_v6 }
 0x1bb   : > { %1643 = vmatprep.subr.bf16.mxu0 %v2025_v61 }
 0x1bc   : > { %1849 = vrsqrt.f32 %v1010_v8 }
 0x1be   : > { %1644 = vmatpush3.bf16.msra.mxu0 %v1844_v4 }
 0x1bf   : > { %1645 = vmatprep.subr.bf16.mxu0 %v2025_v61 }
 0x1c2   : > { %1646 = vmatpush3.bf16.msra.mxu0 %v1845_v7 }
 0x1c3   : > { %1647 = vmatprep.subr.bf16.mxu0 %v2025_v61 }
 0x1c6   : > { %1648 = vmatpush3.bf16.msra.mxu0 %v1846_v9  ;;  %v1850_v16 = vpop.eup %1849 }
 0x1c7   : > { %1649 = vmatprep.subr.bf16.mxu0 %v2025_v61  ;;  %v1012_v17 = vmul.f32 %v1850_v16, %v1009_v13 }
 0x1c9   : > { %v1014_v20 = vmul.f32 %v1012_v17, %v1004_v2  ;;  %v1022_v21 = vrot.slane %v1012_v17, %v1021_v15 }
 0x1ca   : > { %1650 = vmatpush3.bf16.msra.mxu0 %v1847_v11 }
 0x1cb   : > { %1651 = vmatprep.subr.bf16.mxu0 %v2025_v61  ;;  %v1015_v22 = vsub.f32 %v1013_v18, %v1014_v20  ;;  %v1023_v23 = vmul.f32 %v1022_v21, %v1018_v19 }
 0x1cd   : > { %v1027_v24 = vrot.slane %v1015_v22, %v1021_v15 }
 0x1ce   : > { %1652 = vmatpush3.bf16.msra.mxu0 %v1848_v14 }
 0x1cf   : > { %v1028_v25 = vadd.f32 %v1027_v24, %v1023_v23 }
 0x1d1   : > { %1029 = vst [vmem:[%s1017_s7] sm:$0xff] %v1028_v25  ;;  %v1030_v26 = vpack.c.bf16 %v1028_v25, %v1028_v25 }
 0x1d3   : > { %1654 = vmatmul.mubr.bf16.vlgmr.msra.gmra.mrb[0].mxu0 %v1030_v26 }
 0x2a6   : > { %v1134_v28 = vpop.f32.mrb[0].mxu0 }
 0x2a7   : > { %v1135_v29 = vadd.f32 %v1507_v27, %v1134_v28  ;;  %v1655_v30 = vpop.f32.mrb[1].mxu0 }
 0x2a8   : > { %v1137_v31 = vpop.f32.mrb[2].mxu0 }
 0x2a9   : > { %v1140_v32 = vmax.f32 %v1135_v29, 0.0  ;;  %v1656_v33 = vpop.f32.mrb[3].mxu0 }
 0x2ab   : > { %v1142_v34 = vrot.slane %v1140_v32, 4  ;;  %v1151_v35 = vmul.f32 %v1140_v32, %v1140_v32 }
 0x2ad   : > { %v1143_v36 = vadd.f32 %v1142_v34, %v1140_v32  ;;  %v1152_v37 = vrot.slane %v1151_v35, 4 }
 0x2af   : > { %v1144_v38 = vrot.slane %v1143_v36, 2  ;;  %v1153_v39 = vadd.f32 %v1152_v37, %v1151_v35 }
 0x2b1   : > { %v1145_v40 = vadd.f32 %v1144_v38, %v1143_v36  ;;  %v1154_v41 = vrot.slane %v1153_v39, 2 }
 0x2b3   : > { %v1146_v42 = vrot.slane %v1145_v40, 1  ;;  %v1155_v43 = vadd.f32 %v1154_v41, %v1153_v39 }
 0x2b5   : > { %v1147_v45 = vadd.f32 %v1146_v42, %v1145_v40  ;;  %v1156_v46 = vrot.slane %v1155_v43, 1 }
 0x2b7   : > { %v1148_v48 = vadd.f32 %v1147_v45, %v1141_v44  ;;  %v1157_v49 = vadd.f32 %v1156_v46, %v1155_v43 }
 0x2b9   : > { %1149 = vst [vmem:[#allocation3 + $0x2] sm:$0x1] %v1148_v48  ;;  %v1158_v50 = vadd.f32 %v1157_v49, %v1150_v47 }
 0x2bb   : > { %1159 = vst [vmem:[#allocation3 + $0x3] sm:$0x1] %v1158_v50 }
 0x2bc PF: > { %p1516_p11 = scmp.ne.s32.totalorder %s2005_s19, 2 }
 0x2bd   : > { %v1851_v51 = vld [vmem:[#allocation8] sm:$0xff] (!%p1516_p11)   ;;  %v2027_v52 = vmov (!%p1516_p11), 0.0   ;;  %v1852_v53 = vld [vmem:[#allocation8 + $0x8] sm:$0xff] (!%p1516_p11)   ;;  %vm2028_vm1 = vmmov (!%p1516_p11), 0   ;;  %v1853_v54 = vld [vmem:[#allocation8 + $0x10] sm:$0xff] (!%p1516_p11)   ;;  %s1517_s19 = sshll.u32 (!%p1516_p11), %s2001_s18, 3  ;;  %v1291_v7 = vlaneseq (!%p1516_p11) }
 0x2be   : > { %1163 = sbr.rel (%p1516_p11) target bundleno = 1101 (0x44d), region = 64  ;;  %1657 = vmatprep.subr.bf16.mxu0 (!%p1516_p11), %v2027_v52  ;;  %1673 = vmatprep.mubr.msk.bf16.mxu0 (!%p1516_p11), %vm2028_vm1, %v2027_v52  ;;  %v1854_v55 = vld [vmem:[#allocation8 + $0x18] sm:$0xff] (!%p1516_p11)   ;;  %v1855_v56 = vld [vmem:[#allocation8 + $0x20] sm:$0xff] (!%p1516_p11)   ;;  %v1856_v57 = vld [vmem:[#allocation8 + $0x28] sm:$0xff] (!%p1516_p11)   ;;  %s1178_s8 = scalar_lea.vmem (!%p1516_p11), [#allocation2], %s1517_s19  ;;  %vm1315_vm2 = vcmask (!%p1516_p11), 7168  }
 0x2bf   : > { %1658 = vmatpush3.bf16.msra.mxu0 (!%p1516_p11), %v1851_v51  ;;  %v1857_v58 = vld [vmem:[#allocation8 + $0x30] sm:$0xff] (!%p1516_p11)   ;;  %v1858_v59 = vld [vmem:[#allocation8 + $0x38] sm:$0xff] (!%p1516_p11)   ;;  %v1292_v9 = vshrl.u32 (!%p1516_p11), %v1291_v7, 7  ;;  %v1518_v13 = vld [vmem:[%s2313_s3 + $0x3] ss:$0 sm:$0xff] (!%p1516_p11) }
 0x2c0   : > { %1659 = vmatprep.subr.bf16.mxu0 (!%p1516_p11), %v2027_v52  ;;  %v1179_v60 = vld [vmem:[%s1178_s8] sm:$0xff] (!%p1516_p11)  ;;  %v1164_v62 = vld [vmem:[#allocation3 + $0x2] sm:$0x1] (!%p1516_p11) }
 0x2c1   : > { %v1180_v61 = vpack.c.bf16 (!%p1516_p11), %v1179_v60, %v1179_v60  ;;  %v1165_v63 = vmul.f32 (!%p1516_p11), 0.0625, %v1164_v62  ;;  %v1170_v6 = vld [vmem:[%s2313_s3 + $0x4] sm:$0x1] (!%p1516_p11)  ;;  %v1174_v11 = vld [vmem:[%s2313_s3 + $0x5] sm:$0x1] (!%p1516_p11)  ;;  %v1293_v12 = vsub.s32 (!%p1516_p11), 0, %v1292_v9 }
 0x2c2   : > { %v1166_v0 = vld [vmem:[#allocation3 + $0x3] sm:$0x1] (!%p1516_p11)  ;;  %v1527_v24 = vld [vmem:[%s2313_s3 + $0x6] ss:$0 sm:$0xff] (!%p1516_p11)  ;;  %v1528_v27 = vld [vmem:[%s2313_s3 + $0x7] ss:$0 sm:$0xff] (!%p1516_p11) }
 0x2c3   : > { %1660 = vmatpush3.bf16.msra.mxu0 (!%p1516_p11), %v1852_v53  ;;  %v1167_v1 = vmul.f32 (!%p1516_p11), 0.0625, %v1166_v0  ;;  %v1168_v2 = vmul.f32 (!%p1516_p11), %v1165_v63, %v1165_v63 }
 0x2c4   : > { %1661 = vmatprep.subr.bf16.mxu0 (!%p1516_p11), %v2027_v52 }
 0x2c5   : > { %v1169_v3 = vsub.f32 %v1167_v1, %v1168_v2 }
 0x2c7   : > { %1662 = vmatpush3.bf16.msra.mxu0 %v1853_v54  ;;  %v1171_v4 = vadd.f32 1e-05, %v1169_v3 }
 0x2c8   : > { %1663 = vmatprep.subr.bf16.mxu0 %v2027_v52 }
 0x2c9   : > { %1859 = vrsqrt.f32 %v1171_v4 }
 0x2cb   : > { %1664 = vmatpush3.bf16.msra.mxu0 %v1854_v55 }
 0x2cc   : > { %1665 = vmatprep.subr.bf16.mxu0 %v2027_v52 }
 0x2cf   : > { %1666 = vmatpush3.bf16.msra.mxu0 %v1855_v56 }
 0x2d0   : > { %1667 = vmatprep.subr.bf16.mxu0 %v2027_v52 }
 0x2d3   : > { %1668 = vmatpush3.bf16.msra.mxu0 %v1856_v57  ;;  %v1860_v5 = vpop.eup %1859 }
 0x2d4   : > { %1669 = vmatprep.subr.bf16.mxu0 %v2027_v52  ;;  %v1173_v8 = vmul.f32 %v1860_v5, %v1170_v6 }
 0x2d6   : > { %v1175_v10 = vmul.f32 %v1173_v8, %v1165_v63  ;;  %v1294_v17 = vrot.slane %v1173_v8, %v1293_v12 }
 0x2d7   : > { %1670 = vmatpush3.bf16.msra.mxu0 %v1857_v58 }
 0x2d8   : > { %1671 = vmatprep.subr.bf16.mxu0 %v2027_v52  ;;  %v1176_v14 = vsub.f32 %v1174_v11, %v1175_v10 }
 0x2da   : > { %v1299_v22 = vrot.slane %v1176_v14, %v1293_v12 }
 0x2db   : > { %1672 = vmatpush3.bf16.msra.mxu0 %v1858_v59 }
 0x2de   : > { %1674 = vmatmul.mubr.bf16.vlgmr.msra.gmra.mrb[0].mxu0 %v1180_v61 }
 0x3b1   : > { %v1284_v15 = vpop.f32.mrb[0].mxu0 }
 0x3b2   : > { %v1285_v16 = vadd.f32 %v1518_v13, %v1284_v15  ;;  %v1675_v18 = vpop.f32.mrb[1].mxu0 }
 0x3b3   : > { %v1287_v19 = vpop.f32.mrb[2].mxu0 }
 0x3b4   : > { %v1290_v20 = vmax.f32 %v1285_v16, 0.0  ;;  %v1676_v21 = vpop.f32.mrb[3].mxu0 }
 0x3b6   : > { %v1295_v23 = vmul.f32 %v1294_v17, %v1290_v20 }
 0x3b8   : > { %v1300_v25 = vadd.f32 %v1299_v22, %v1295_v23 }
 0x3ba   : > { %v1306_v26 = vmul.f32 %v1527_v24, %v1300_v25 }
 0x3bc   : > { %1307 = vadd.xlane.f32.xlu0 %v1306_v26 }
 0x449   : > { %v1308_v28 = vpop.xlane.xlu0 %1307 }
 0x44a   : > { %v1314_v29 = vadd.f32 %v1528_v27, %v1308_v28 }
 0x44c   : > { %1316 = vst.msk [vmem:[%s2241_s29] sm:$0xff] %vm1315_vm2, %v1314_v29 }
 0x44d PF: > { %s18_s22 = sadd.s32 1, %s2017_s22   ;;  %s2327_s15 = smov %s1993_s16 }
 0x44e   : > { %p15_p12 = scmp.ge.s32.totalorder %s18_s22, 8   ;;  %s2328_s16 = smov %s1997_s17 }
 0x44f   : > { %s2329_s17 = smov %s2196_s13  ;;  %s2330_s18 = smov %s2009_s20 }
 0x450   : > { %s2331_s19 = smov %s2013_s21  ;;  %s2332_s20 = smov %s2335_s23 }
 0x451   : > { %s2333_s21 = smov %s2339_s27  ;;  %17 = sbr.rel (!%p15_p12) target bundleno = 6 (0x6), region = 103 }
 0x458   :  { %1342 = vsyncpa [#allocation5], 1 }
 0x459   :  { %1344 = vsyncpa [#allocation5 + $0x1], 1 }
 0x45a   :  { %1345 = vsyncpa [#allocation7], 1 }

</bundles_post_ra>
